<compile_context>
chip_gen: v5e
topology: v5e:2x2
jax: 0.10.0
libtpu: 0.0.40
codegen_flags: <defaults>
</compile_context>

<pallas_src>
import functools

import jax
import jax.numpy as jnp
from jax import lax
from jax.experimental import pallas as pl
from jax.experimental.pallas import tpu as pltpu


# --------------------------------------------------------------------------- kernels
def _prep_kernel(x_ref, mask_ref, xd_ref, xdn_ref, *, inv_keep):
    # Fused: F.dropout (zero + 1/(1-p) rescale)  and  F.normalize(xd, dim=-1).
    xd = x_ref[...].astype(jnp.float32) * mask_ref[...].astype(jnp.float32) * inv_keep
    sumsq = jnp.sum(xd * xd, axis=-1, keepdims=True)
    inv_norm = lax.rsqrt(jnp.maximum(sumsq, 1e-24))        # == 1 / max(||xd||, 1e-12)
    xd_ref[...] = xd.astype(xd_ref.dtype)
    xdn_ref[...] = (xd * inv_norm).astype(xdn_ref.dtype)


def _agnn_kernel(xd_ref, xdnT_ref, xtn_ref, adjt_ref, h_ref, csum_ref, *, beta):
    # xd_ref   : (N, F)  bf16 dropout-applied sources, resident across the grid
    # xdnT_ref : (F, N)  bf16 normalized sources, transposed once in the wrapper
    # xtn_ref  : (TR, F) bf16 normalized targets for this row tile
    # adjt_ref : (TR, N) int8  adj.T tile with self-loop diagonal baked in
    # h_ref    : (TR, F) aggregated features (bf16)
    # csum_ref : (1, F)  f32 partial column sums for PairNorm mean (per-tile output block)
    # attention logits: beta * cosine similarity — plain NN contraction on the MXU.
    scores = jnp.dot(xtn_ref[...], xdnT_ref[...],
                     preferred_element_type=jnp.float32)            # (TR, N)
    if beta != 1.0:
        scores = scores * beta

    edge = adjt_ref[...] != 0                                       # self-loops already baked
    s = jnp.where(edge, scores, -jnp.inf)
    m = jnp.max(s, axis=-1, keepdims=True)                          # finite: diagonal baked
    p = jnp.exp(s - m)                                              # unnormalized weights
    rowsum = jnp.sum(p, axis=-1, keepdims=True)

    acc = jnp.dot(p.astype(jnp.bfloat16), xd_ref[...],
                  preferred_element_type=jnp.float32)               # (TR, F)
    h = acc * pl.reciprocal(rowsum, approx=True)                    # deferred softmax norm (EUP)

    h_ref[...] = h.astype(h_ref.dtype)
    csum_ref[...] = jnp.sum(h, axis=0, keepdims=True)               # PairNorm partial col-sum


def _pairnorm_relu_kernel(h_ref, colsum_ref, o_ref, *, inv_n, norm_scale):
    h = h_ref[...].astype(jnp.float32)
    hc = h - colsum_ref[...] * inv_n                                # subtract column mean
    inv_rn = lax.rsqrt(1e-6 + jnp.sum(hc * hc, axis=-1, keepdims=True))  # PN-SI row norm (EUP)
    o_ref[...] = jnp.maximum(norm_scale * hc * inv_rn, 0.0).astype(o_ref.dtype)


# --------------------------------------------------------------------------- wrapper
def agnn_norm_forward(x, adj, dropout_mask, *, dropout_p=0.5, beta=1.0,
                      norm_scale=1.0, tile_rows=None):
    """Pallas implementation of AGNN_norm.forward. Returns (out, adj)."""
    n, f = x.shape
    assert adj.shape == (n, n)
    assert dropout_mask.shape == (n, f)

    if tile_rows is None:
        tile_rows = min(n, 256)
    assert n % tile_rows == 0, "tile_rows must divide N (pad otherwise)"
    assert tile_rows == n or tile_rows % 32 == 0     # int8 (32,128) tiling on adj^T tile

    n_tiles = n // tile_rows
    grid = (n_tiles,)
    dtype = x.dtype
    cdt = jnp.bfloat16                               # MXU / intermediate storage dtype
    inv_keep = 1.0 / (1.0 - dropout_p)
    parallel = pltpu.CompilerParams(dimension_semantics=("parallel",))

    # 1) fused dropout + L2 row-normalization (both outputs in bf16 for the MXU)
    xd, xdn = pl.pallas_call(
        functools.partial(_prep_kernel, inv_keep=inv_keep),
        out_shape=(jax.ShapeDtypeStruct((n, f), cdt),
                   jax.ShapeDtypeStruct((n, f), cdt)),
        grid=grid,
        in_specs=[pl.BlockSpec((tile_rows, f), lambda i: (i, 0)),
                  pl.BlockSpec((tile_rows, f), lambda i: (i, 0))],
        out_specs=(pl.BlockSpec((tile_rows, f), lambda i: (i, 0)),
                   pl.BlockSpec((tile_rows, f), lambda i: (i, 0))),
        compiler_params=parallel,
    )(x, dropout_mask)

    # One-time layout plumbing in the wrapper (outside the per-tile loop):
    #   * int8 adjacency transpose with the self-loop diagonal baked in (connectivity only),
    #   * (F, N) normalized-source matrix so the score matmul is a plain NN contraction.
    adjt_i8 = ((adj != 0) | jnp.eye(n, dtype=bool)).T.astype(jnp.int8)
    xdn_t = xdn.T                                                   # (F, N) bf16

    # VMEM budget for the attention kernel (raise the scoped default only when needed).
    vmem_est = (
        2 * n * f * 2                      # resident xd + xdn_T (bf16)
        + 2 * tile_rows * n                # double-buffered int8 adj^T tile
        + 4 * tile_rows * f * 2            # double-buffered target tile + h output (bf16)
        + 4 * tile_rows * n * 4            # live f32 scores / mask / p intermediates
        + (1 << 20)                        # headroom
    )
    k2_kwargs = dict(dimension_semantics=("parallel",))
    if vmem_est > (32 << 20):
        # TODO(synk): on v7x (64 MiB VMEM) prefer shrinking tile_rows / source-tiling instead.
        k2_kwargs["vmem_limit_bytes"] = min(vmem_est, 96 << 20)
    k2_params = pltpu.CompilerParams(**k2_kwargs)

    # 2) AGNN attention + propagate, with fused per-tile PairNorm column partial sums
    h, csum_part = pl.pallas_call(
        functools.partial(_agnn_kernel, beta=beta),
        out_shape=(jax.ShapeDtypeStruct((n, f), cdt),
                   jax.ShapeDtypeStruct((n_tiles, 1, f), jnp.float32)),
        grid=grid,
        in_specs=[pl.BlockSpec((n, f), lambda i: (0, 0)),            # xd resident (bf16)
                  pl.BlockSpec((f, n), lambda i: (0, 0)),            # xdn^T resident (bf16)
                  pl.BlockSpec((tile_rows, f), lambda i: (i, 0)),    # normalized target tile
                  pl.BlockSpec((tile_rows, n), lambda i: (i, 0))],   # adj^T tile (int8)
        out_specs=(pl.BlockSpec((tile_rows, f), lambda i: (i, 0)),
                   pl.BlockSpec((None, 1, f), lambda i: (i, 0, 0))),
        compiler_params=k2_params,
    )(xd, xdn_t, xdn, adjt_i8)

    # Tiny (n_tiles, 1, F) reduction for the PairNorm column mean — leave to XLA.
    col_sum = jnp.sum(csum_part, axis=0)                             # (1, F) f32

    # 3) PairNorm (PN-SI) + ReLU
    out = pl.pallas_call(
        functools.partial(_pairnorm_relu_kernel, inv_n=1.0 / n, norm_scale=norm_scale),
        out_shape=jax.ShapeDtypeStruct((n, f), dtype),
        grid=grid,
        in_specs=[pl.BlockSpec((tile_rows, f), lambda i: (i, 0)),
                  pl.BlockSpec((1, f), lambda i: (0, 0))],
        out_specs=pl.BlockSpec((tile_rows, f), lambda i: (i, 0)),
        compiler_params=parallel,
    )(h, col_sum)

    return out, adj


# --------------------------------------------------------------------------- reference
def agnn_norm_reference(x, adj, dropout_mask, dropout_p, beta, norm_scale):
    hp = jax.lax.Precision.HIGHEST
    xd = x * dropout_mask * (1.0 / (1.0 - dropout_p))
    xn = xd / jnp.maximum(jnp.sqrt(jnp.sum(xd * xd, axis=-1, keepdims=True)), 1e-12)
    scores = beta * jnp.dot(xn, xn.T, precision=hp)
    n = x.shape[0]
    edge = (adj.T != 0) | jnp.eye(n, dtype=bool)       # sources j of target i: adj[j, i] != 0
    s = jnp.where(edge, scores, -jnp.inf)
    p = jax.nn.softmax(s, axis=-1)
    h = jnp.dot(p, xd, precision=hp)
    hc = h - jnp.mean(h, axis=0, keepdims=True)
    rn = jnp.sqrt(1e-6 + jnp.sum(hc * hc, axis=-1, keepdims=True))
    y = jnp.maximum(norm_scale * hc / rn, 0.0)
    return y, adj


# --------------------------------------------------------------------------- demo
if __name__ == "__main__":
    key = jax.random.PRNGKey(0)
    k_x, k_adj, k_drop = jax.random.split(key, 3)

    N, F = 128, 32
    DROPOUT_P = 0.5

    x = jax.random.normal(k_x, (N, F), dtype=jnp.float32)
    # 0/1 adjacency (AGNNConv only uses connectivity); deliberately non-symmetric.
    adj = (jax.random.uniform(k_adj, (N, N)) < 0.1).astype(jnp.float32)
    # Deterministic dropout keep-mask, shared between kernel and reference.
    # TODO(synk): on real TPU this could use the in-kernel HW PRNG (pltpu.prng_seed);
    # kept in the wrapper so kernel and reference see the identical mask.
    keep_mask = jax.random.bernoulli(k_drop, 1.0 - DROPOUT_P, (N, F)).astype(jnp.float32)

    out, adj_out = agnn_norm_forward(x, adj, keep_mask, dropout_p=DROPOUT_P,
                                     beta=1.0, norm_scale=1.0, tile_rows=64)
    jax.block_until_ready((out, adj_out))

    ref_out, _ = agnn_norm_reference(x, adj, keep_mask, DROPOUT_P, 1.0, 1.0)

    assert out.shape == (N, F) and adj_out.shape == (N, N)
    assert bool(jnp.all(adj_out == adj))               # adj is a pass-through
    assert bool(jnp.all(out >= 0.0))                   # ReLU
    assert bool(jnp.all(jnp.isfinite(out)))
    # Tolerance covers bf16 MXU operands / bf16 intermediate vs HIGHEST-precision f32 reference.
    assert bool(jnp.allclose(out, ref_out, rtol=2.5e-2, atol=2.5e-2))

    print("KERNEL_OK")
</pallas_src>

<mosaic_0001>
module attributes {stable_mosaic.version = 11 : i64} {
  func.func @_prep_kernel(%arg0: i32, %arg1: memref<64x32xf32, #tpu.memory_space<vmem>>, %arg2: memref<64x32xf32, #tpu.memory_space<vmem>>, %arg3: memref<64x32xbf16, #tpu.memory_space<vmem>>, %arg4: memref<64x32xbf16, #tpu.memory_space<vmem>>) attributes {dimension_semantics = [#tpu.dimension_semantics<parallel>], iteration_bounds = array<i64: 2>, scalar_prefetch = 0 : i64, scratch_operands = 0 : i64, tpu.core_type = #tpu.core_type<tc>, window_params = [{transform_indices = @transform_0, window_bounds = array<i64: 64, 32>}, {transform_indices = @transform_1, window_bounds = array<i64: 64, 32>}, {transform_indices = @transform_2, window_bounds = array<i64: 64, 32>}, {transform_indices = @transform_3, window_bounds = array<i64: 64, 32>}]} {
    %c0 = arith.constant 0 : index
    %c0_0 = arith.constant 0 : index
    %0 = vector.load %arg1[%c0, %c0_0] : memref<64x32xf32, #tpu.memory_space<vmem>>, vector<64x32xf32>
    %c0_1 = arith.constant 0 : index
    %c0_2 = arith.constant 0 : index
    %1 = vector.load %arg2[%c0_1, %c0_2] : memref<64x32xf32, #tpu.memory_space<vmem>>, vector<64x32xf32>
    %2 = arith.mulf %0, %1 : vector<64x32xf32>
    %cst = arith.constant 2.000000e+00 : f32
    %3 = vector.broadcast %cst : f32 to vector<64x32xf32>
    %4 = arith.mulf %2, %3 : vector<64x32xf32>
    %5 = arith.mulf %4, %4 : vector<64x32xf32>
    %cst_3 = arith.constant dense<0.000000e+00> : vector<64xf32>
    %6 = vector.multi_reduction <add>, %5, %cst_3 [1] : vector<64x32xf32> to vector<64xf32>
    %7 = vector.shape_cast %6 : vector<64xf32> to vector<64x1xf32>
    %cst_4 = arith.constant 1.000000e-24 : f32
    %8 = vector.broadcast %cst_4 : f32 to vector<64x1xf32>
    %9 = arith.maximumf %7, %8 : vector<64x1xf32>
    %10 = math.rsqrt %9 : vector<64x1xf32>
    %11 = arith.truncf %4 : vector<64x32xf32> to vector<64x32xbf16>
    %c0_5 = arith.constant 0 : index
    %c0_6 = arith.constant 0 : index
    %12 = vector.load %arg3[%c0_5, %c0_6] : memref<64x32xbf16, #tpu.memory_space<vmem>>, vector<64x32xbf16>
    tpu.vector_store %arg3[%c0_5, %c0_6], %11 {strides = array<i32>} : memref<64x32xbf16, #tpu.memory_space<vmem>>, vector<64x32xbf16>,
    %13 = vector.broadcast %10 : vector<64x1xf32> to vector<64x32xf32>
    %14 = arith.mulf %4, %13 : vector<64x32xf32>
    %15 = arith.truncf %14 : vector<64x32xf32> to vector<64x32xbf16>
    %c0_7 = arith.constant 0 : index
    %c0_8 = arith.constant 0 : index
    %16 = vector.load %arg4[%c0_7, %c0_8] : memref<64x32xbf16, #tpu.memory_space<vmem>>, vector<64x32xbf16>
    tpu.vector_store %arg4[%c0_7, %c0_8], %15 {strides = array<i32>} : memref<64x32xbf16, #tpu.memory_space<vmem>>, vector<64x32xbf16>,
    return
  }
  func.func @transform_0(%arg0: i32) -> (i32, i32) {
    %c0_i32 = arith.constant 0 : i32
    %c0_i32_0 = arith.constant 0 : i32
    return %arg0, %c0_i32 : i32, i32
  }
  func.func @transform_1(%arg0: i32) -> (i32, i32) {
    %c0_i32 = arith.constant 0 : i32
    %c0_i32_0 = arith.constant 0 : i32
    return %arg0, %c0_i32 : i32, i32
  }
  func.func @transform_2(%arg0: i32) -> (i32, i32) {
    %c0_i32 = arith.constant 0 : i32
    %c0_i32_0 = arith.constant 0 : i32
    return %arg0, %c0_i32 : i32, i32
  }
  func.func @transform_3(%arg0: i32) -> (i32, i32) {
    %c0_i32 = arith.constant 0 : i32
    %c0_i32_0 = arith.constant 0 : i32
    return %arg0, %c0_i32 : i32, i32
  }
}

</mosaic_0001>

<bundles_post_ra>
// kernel: tpu_custom_call.1
= control target key start
LH: loop header
LB: loop body
LE: loop exit
PB: predicated region body
PF: predicated region fallthrough
CT: control target
= control target key end

     0   :  { %s573_s12 = smov 0   ;;  %s748_s0 = inlined_call_operand.vmem [shape: f32[128,32], index: 0, kind: input, shape index: {}]   ;;  %s749_s1 = inlined_call_operand.vmem [shape: f32[128,32], index: 1, kind: input, shape index: {}]   ;;  %s750_s2 = inlined_call_operand.vmem [shape: bf16[128,32], index: 2, kind: output, shape index: {0}]   ;;  %s751_s3 = inlined_call_operand.vmem [shape: bf16[128,32], index: 3, kind: output, shape index: {1}]  }
   0x1 LB: > { %s506_s13 = sadd.s32 4294967295, %s551_s12   ;;  %p510_p0 = scmp.ge.s32.totalorder %s551_s12, 1  ;;  %s551_s12 = sphi %s573_s12, %s14_s12  }
   0x2   : > { %p152_p1 = scmp.lt.s32.totalorder %s551_s12, 3 }
   0x4   : > { %p153_p2 = pnand %p510_p0, %p152_p1 }
   0x5   : > { %s511_s14 = sshll.u32 (!%p153_p2), %s506_s13, 3 }
   0x6   : > { %156 = sbr.rel (%p153_p2) target bundleno = 186 (0xba), region = 28  ;;  %p187_p3 = scmp.lt.s32.totalorder (!%p153_p2), %s511_s14, 15 }
   0xb   : > { %s753_s14 = smov (!%p187_p3, %s511_s14), 15  ;;  %vm250_vm0 = vcmask 261120   ;;  %vm371_vm1 = vcmask 257024  }
   0xc   : > { %s512_s15 = sshll.u32 %s753_s14, 3  ;;  %s516_s22 = sshll.u32 %s753_s14, 2 }
   0xd   : > { %s587_s18 = scalar_lea.vmem %s748_s0, %s512_s15  ;;  %s592_s21 = scalar_lea.vmem %s749_s1, %s512_s15 }
   0xe   : > { %v214_v0 = vld [vmem:[%s587_s18 + $0x20] sm:$0xff]  ;;  %v212_v2 = vld [vmem:[%s587_s18 + $0x10] sm:$0xff]  ;;  %v215_v9 = vld [vmem:[%s587_s18 + $0x28] sm:$0xff]  ;;  %s614_s25 = scalar_lea.vmem %s750_s2, %s516_s22  ;;  %s713_s28 = scalar_lea.vmem %s751_s3, %s516_s22 }
   0xf   : > { %v222_v1 = vld [vmem:[%s592_s21 + $0x20] sm:$0xff]  ;;  %v220_v4 = vld [vmem:[%s592_s21 + $0x10] sm:$0xff]  ;;  %v223_v10 = vld [vmem:[%s592_s21 + $0x28] sm:$0xff] }
  0x10   : > { %v230_v3 = vmul.f32 %v222_v1, %v214_v0  ;;  %v210_v5 = vld [vmem:[%s587_s18] sm:$0xff]  ;;  %v228_v7 = vmul.f32 %v220_v4, %v212_v2  ;;  %v213_v11 = vld [vmem:[%s587_s18 + $0x18] sm:$0xff]  ;;  %v231_v13 = vmul.f32 %v223_v10, %v215_v9  ;;  %v211_v15 = vld [vmem:[%s587_s18 + $0x8] sm:$0xff] }
  0x11   : > { %v218_v6 = vld [vmem:[%s592_s21] sm:$0xff]  ;;  %v221_v14 = vld [vmem:[%s592_s21 + $0x18] sm:$0xff]  ;;  %v219_v16 = vld [vmem:[%s592_s21 + $0x8] sm:$0xff] }
  0x12   : > { %v226_v8 = vmul.f32 %v218_v6, %v210_v5  ;;  %v604_v12 = vmul.f32 2.0, %v230_v3  ;;  %v616_v17 = vmul.f32 2.0, %v228_v7  ;;  %v229_v19 = vmul.f32 %v221_v14, %v213_v11  ;;  %v217_v21 = vld [vmem:[%s587_s18 + $0x38] sm:$0xff]  ;;  %v216_v34 = vld [vmem:[%s587_s18 + $0x30] sm:$0xff] }
  0x13   : > { %v227_v20 = vmul.f32 %v219_v16, %v211_v15  ;;  %v225_v22 = vld [vmem:[%s592_s21 + $0x38] sm:$0xff]  ;;  %v626_v25 = vmul.f32 2.0, %v231_v13  ;;  %v224_v35 = vld [vmem:[%s592_s21 + $0x30] sm:$0xff] }
  0x14   : > { %v618_v18 = vmul.f32 2.0, %v226_v8  ;;  %v246_v23 = vmul.f32 %v604_v12, %v604_v12  ;;  %v367_v24 = vpack.c.bf16 %v604_v12, %v604_v12  ;;  %v233_v26 = vmul.f32 %v225_v22, %v217_v21 }
  0x15   : > { %v244_v27 = vmul.f32 %v616_v17, %v616_v17  ;;  %v365_v28 = vpack.c.bf16 %v616_v17, %v616_v17  ;;  %v368_v32 = vpack.c.bf16 %v626_v25, %v626_v25  ;;  %v641_v33 = vmul.f32 2.0, %v229_v19 }
  0x16   : > { %v242_v29 = vmul.f32 %v618_v18, %v618_v18  ;;  %v363_v30 = vpack.c.bf16 %v618_v18, %v618_v18  ;;  %v263_v31 = vsel %vm250_vm0, %v246_v23, 0.0  ;;  %376 = vst.msk [vmem:[%s614_s25 + $0x10] sm:$0xf] %vm371_vm1, %v367_v24  ;;  %v649_v38 = vmul.f32 2.0, %v227_v20 }
  0x17   : > { %264 = vadd.xlane.f32.xlu2 %v263_v31  ;;  %v257_v36 = vsel %vm250_vm0, %v244_v27, 0.0  ;;  %374 = vst.msk [vmem:[%s614_s25 + $0x8] sm:$0xf] %vm371_vm1, %v365_v28  ;;  %v651_v39 = vmul.f32 2.0, %v233_v26  ;;  %v247_v40 = vmul.f32 %v626_v25, %v626_v25  ;;  %v366_v41 = vpack.c.bf16 %v641_v33, %v641_v33 }
  0x18   : > { %v251_v37 = vsel %vm250_vm0, %v242_v29, 0.0  ;;  %258 = vadd.xlane.f32.xlu1 %v257_v36  ;;  %372 = vst.msk [vmem:[%s614_s25] sm:$0xf] %vm371_vm1, %v363_v30  ;;  %v245_v42 = vmul.f32 %v641_v33, %v641_v33  ;;  %v243_v43 = vmul.f32 %v649_v38, %v649_v38  ;;  %v364_v44 = vpack.c.bf16 %v649_v38, %v649_v38 }
  0x19   : > { %252 = vadd.xlane.f32.xlu0 %v251_v37  ;;  %377 = vst.msk [vmem:[%s614_s25 + $0x14] sm:$0xf] %vm371_vm1, %v368_v32  ;;  %v370_v45 = vpack.c.bf16 %v651_v39, %v651_v39  ;;  %v232_v46 = vmul.f32 %v224_v35, %v216_v34  ;;  %v266_v47 = vsel %vm250_vm0, %v247_v40, 0.0  ;;  %v249_v52 = vmul.f32 %v651_v39, %v651_v39 }
  0x1a   : > { %375 = vst.msk [vmem:[%s614_s25 + $0xc] sm:$0xf] %vm371_vm1, %v366_v41  ;;  %v260_v49 = vsel %vm250_vm0, %v245_v42, 0.0  ;;  %v254_v50 = vsel %vm250_vm0, %v243_v43, 0.0 }
  0x1b   : > { %373 = vst.msk [vmem:[%s614_s25 + $0x4] sm:$0xf] %vm371_vm1, %v364_v44  ;;  %v676_v48 = vmul.f32 2.0, %v232_v46  ;;  %v272_v54 = vsel %vm250_vm0, %v249_v52, 0.0 }
  0x1c   : > { %379 = vst.msk [vmem:[%s614_s25 + $0x1c] sm:$0xf] %vm371_vm1, %v370_v45 }
  0x1d   : > { %v369_v51 = vpack.c.bf16 %v676_v48, %v676_v48  ;;  %v248_v53 = vmul.f32 %v676_v48, %v676_v48 }
  0x1f   : > { %267 = vadd.xlane.f32.xlu2 %v266_v47  ;;  %378 = vst.msk [vmem:[%s614_s25 + $0x18] sm:$0xf] %vm371_vm1, %v369_v51  ;;  %v269_v55 = vsel %vm250_vm0, %v248_v53, 0.0 }
  0x20   : > { %261 = vadd.xlane.f32.xlu1 %v260_v49 }
  0x21   : > { %255 = vadd.xlane.f32.xlu0 %v254_v50 }
  0x28   : > { %273 = vadd.xlane.f32.xlu1 %v272_v54 }
  0x29   : > { %270 = vadd.xlane.f32.xlu0 %v269_v55 }
  0x8a   : > { %v265_v56 = vpop.xlane.xlu2 %264 }
  0x8b   : > { %v279_v57 = vmax.f32 %v265_v56, 1e-24  ;;  %v259_v58 = vpop.xlane.xlu1 %258 }
  0x8c   : > { %v253_v59 = vpop.xlane.xlu0 %252  ;;  %v277_v60 = vmax.f32 %v259_v58, 1e-24 }
  0x8d   : > { %v275_v61 = vmax.f32 %v253_v59, 1e-24  ;;  %529 = vrsqrt.f32 %v279_v57  ;;  %vm329_vm2 = vweird.f32 %v279_v57 }
  0x8e   : > { %531 = vrsqrt.f32 %v277_v60  ;;  %vm309_vm4 = vweird.f32 %v277_v60 }
  0x8f   : > { %533 = vrsqrt.f32 %v275_v61  ;;  %vm289_vm8 = vweird.f32 %v275_v61 }
  0x92   : > { %v268_v62 = vpop.xlane.xlu2 %267 }
  0x93   : > { %v530_v63 = vpop.eup %529  ;;  %v690_v0 = vmax.f32 %v268_v62, 1e-24  ;;  %v262_v1 = vpop.xlane.xlu1 %261 }
  0x94   : > { %v256_v2 = vpop.xlane.xlu0 %255  ;;  %v532_v3 = vpop.eup %531  ;;  %v324_v4 = vmul.f32 %v530_v63, %v279_v57  ;;  %v692_v5 = vmax.f32 %v262_v1, 1e-24  ;;  %vm330_vm3 = vweird.f32 %v530_v63 }
  0x95   : > { %v694_v6 = vmax.f32 %v256_v2, 1e-24  ;;  %v534_v7 = vpop.eup %533  ;;  %v304_v8 = vmul.f32 %v532_v3, %v277_v60  ;;  %535 = vrsqrt.f32 %v690_v0  ;;  %vm310_vm5 = vweird.f32 %v532_v3  ;;  %vm331_vm7 = vmor %vm329_vm2, %vm330_vm3 }
  0x96   : > { %v325_v9 = vmul.f32 %v530_v63, %v324_v4  ;;  %v284_v10 = vmul.f32 %v534_v7, %v275_v61  ;;  %537 = vrsqrt.f32 %v692_v5  ;;  %vm290_vm6 = vweird.f32 %v534_v7  ;;  %vm311_vm9 = vmor %vm309_vm4, %vm310_vm5 }
  0x97   : > { %v305_v11 = vmul.f32 %v532_v3, %v304_v8  ;;  %539 = vrsqrt.f32 %v694_v6  ;;  %vm291_vm10 = vmor %vm289_vm8, %vm290_vm6  ;;  %vm339_vm11 = vweird.f32 %v690_v0  ;;  %vm319_vm0 = vweird.f32 %v692_v5 }
  0x98   : > { %v326_v13 = vmul.f32 0.5, %v325_v9  ;;  %v285_v14 = vmul.f32 %v534_v7, %v284_v10  ;;  %vm299_vm3 = vweird.f32 %v694_v6 }
  0x99   : > { %v306_v15 = vmul.f32 0.5, %v305_v11 }
  0x9a   : > { %v327_v16 = vsub.f32 1.5, %v326_v13  ;;  %v286_v19 = vmul.f32 0.5, %v285_v14 }
  0x9b   : > { %v536_v20 = vpop.eup %535  ;;  %v307_v21 = vsub.f32 1.5, %v306_v15  ;;  %v274_v22 = vpop.xlane.xlu1 %273 }
  0x9c   : > { %v538_v23 = vpop.eup %537  ;;  %v328_v24 = vmul.f32 %v530_v63, %v327_v16  ;;  %v287_v26 = vsub.f32 1.5, %v286_v19  ;;  %v334_v27 = vmul.f32 %v536_v20, %v690_v0  ;;  %v701_v31 = vmax.f32 %v274_v22, 1e-24 }
  0x9d   : > { %v540_v28 = vpop.eup %539  ;;  %v308_v29 = vmul.f32 %v532_v3, %v307_v21  ;;  %v314_v30 = vmul.f32 %v538_v23, %v692_v5  ;;  %vm340_vm12 = vweird.f32 %v536_v20  ;;  %vm320_vm13 = vweird.f32 %v538_v23 }
  0x9e   : > { %v332_v32 = vsel %vm331_vm7, %v530_v63, %v328_v24  ;;  %v288_v34 = vmul.f32 %v534_v7, %v287_v26  ;;  %v335_v35 = vmul.f32 %v536_v20, %v334_v27  ;;  %v294_v36 = vmul.f32 %v540_v28, %v694_v6  ;;  %vm341_vm15 = vmor %vm339_vm11, %vm340_vm12 }
  0x9f   : > { %v384_v37 = vmul.f32 %v332_v32, %v604_v12  ;;  %v312_v40 = vsel %vm311_vm9, %v532_v3, %v308_v29  ;;  %v315_v41 = vmul.f32 %v538_v23, %v314_v30  ;;  %v271_v12 = vpop.xlane.xlu0 %270  ;;  %541 = vrsqrt.f32 %v701_v31  ;;  %vm321_vm2 = vmor %vm319_vm0, %vm320_vm13 }
  0xa0   : > { %v382_v42 = vmul.f32 %v312_v40, %v616_v17  ;;  %v292_v43 = vsel %vm291_vm10, %v534_v7, %v288_v34  ;;  %v336_v44 = vmul.f32 0.5, %v335_v35  ;;  %v295_v45 = vmul.f32 %v540_v28, %v294_v36 }
  0xa1   : > { %v392_v46 = vpack.c.bf16 %v384_v37, %v384_v37  ;;  %v380_v47 = vmul.f32 %v292_v43, %v618_v18  ;;  %v316_v49 = vmul.f32 0.5, %v315_v41  ;;  %v281_v54 = vmax.f32 %v271_v12, 1e-24 }
  0xa2   : > { %v390_v50 = vpack.c.bf16 %v382_v42, %v382_v42  ;;  %v337_v51 = vsub.f32 1.5, %v336_v44  ;;  %v296_v52 = vmul.f32 0.5, %v295_v45  ;;  %vm300_vm14 = vweird.f32 %v540_v28 }
  0xa3   : > { %400 = vst.msk [vmem:[%s713_s28 + $0x10] sm:$0xf] %vm371_vm1, %v392_v46  ;;  %v388_v53 = vpack.c.bf16 %v380_v47, %v380_v47  ;;  %v317_v17 = vsub.f32 1.5, %v316_v49  ;;  %543 = vrsqrt.f32 %v281_v54  ;;  %vm301_vm4 = vmor %vm299_vm3, %vm300_vm14  ;;  %vm359_vm6 = vweird.f32 %v701_v31 }
  0xa4   : > { %398 = vst.msk [vmem:[%s713_s28 + $0x8] sm:$0xf] %vm371_vm1, %v390_v50  ;;  %v338_v55 = vmul.f32 %v536_v20, %v337_v51  ;;  %v297_v56 = vsub.f32 1.5, %v296_v52  ;;  %vm349_vm9 = vweird.f32 %v281_v54 }
  0xa5   : > { %396 = vst.msk [vmem:[%s713_s28] sm:$0xf] %vm371_vm1, %v388_v53  ;;  %v318_v18 = vmul.f32 %v538_v23, %v317_v17  ;;  %v542_v59 = vpop.eup %541 }
  0xa6   : > { %v342_v57 = vsel %vm341_vm15, %v536_v20, %v338_v55  ;;  %v298_v58 = vmul.f32 %v540_v28, %v297_v56  ;;  %v354_v0 = vmul.f32 %v542_v59, %v701_v31  ;;  %vm360_vm5 = vweird.f32 %v542_v59 }
  0xa7   : > { %v385_v60 = vmul.f32 %v342_v57, %v626_v25  ;;  %v322_v61 = vsel %vm321_vm2, %v538_v23, %v318_v18  ;;  %vm361_vm7 = vmor %vm359_vm6, %vm360_vm5 }
  0xa8   : > { %v383_v62 = vmul.f32 %v322_v61, %v641_v33  ;;  %v302_v63 = vsel %vm301_vm4, %v540_v28, %v298_v58  ;;  %v355_v4 = vmul.f32 %v542_v59, %v354_v0 }
  0xa9   : > { %v393_v1 = vpack.c.bf16 %v385_v60, %v385_v60  ;;  %v381_v2 = vmul.f32 %v302_v63, %v649_v38  ;;  %v544_v5 = vpop.eup %543 }
  0xaa   : > { %v391_v3 = vpack.c.bf16 %v383_v62, %v383_v62  ;;  %v356_v25 = vmul.f32 0.5, %v355_v4  ;;  %v344_v7 = vmul.f32 %v544_v5, %v281_v54  ;;  %vm350_vm8 = vweird.f32 %v544_v5 }
  0xab   : > { %401 = vst.msk [vmem:[%s713_s28 + $0x14] sm:$0xf] %vm371_vm1, %v393_v1  ;;  %v389_v6 = vpack.c.bf16 %v381_v2, %v381_v2  ;;  %vm351_vm10 = vmor %vm349_vm9, %vm350_vm8 }
  0xac   : > { %399 = vst.msk [vmem:[%s713_s28 + $0xc] sm:$0xf] %vm371_vm1, %v391_v3  ;;  %v357_v8 = vsub.f32 1.5, %v356_v25  ;;  %v345_v33 = vmul.f32 %v544_v5, %v344_v7 }
  0xad   : > { %397 = vst.msk [vmem:[%s713_s28 + $0x4] sm:$0xf] %vm371_vm1, %v389_v6 }
  0xae   : > { %v358_v9 = vmul.f32 %v542_v59, %v357_v8  ;;  %v346_v38 = vmul.f32 0.5, %v345_v33 }
  0xb0   : > { %v362_v10 = vsel %vm361_vm7, %v542_v59, %v358_v9  ;;  %v347_v11 = vsub.f32 1.5, %v346_v38 }
  0xb1   : > { %v387_v13 = vmul.f32 %v362_v10, %v651_v39 }
  0xb2   : > { %v348_v14 = vmul.f32 %v544_v5, %v347_v11 }
  0xb3   : > { %v395_v15 = vpack.c.bf16 %v387_v13, %v387_v13 }
  0xb4   : > { %v352_v16 = vsel %vm351_vm10, %v544_v5, %v348_v14 }
  0xb5   : > { %403 = vst.msk [vmem:[%s713_s28 + $0x1c] sm:$0xf] %vm371_vm1, %v395_v15  ;;  %v386_v19 = vmul.f32 %v352_v16, %v676_v48 }
  0xb7   : > { %v394_v20 = vpack.c.bf16 %v386_v19, %v386_v19 }
  0xb9   : > { %402 = vst.msk [vmem:[%s713_s28 + $0x18] sm:$0xf] %vm371_vm1, %v394_v20 }
  0xba PF: > { %s14_s12 = sadd.s32 1, %s551_s12  }
  0xbb   : > { %p11_p4 = scmp.ge.s32.totalorder %s14_s12, 4  }
  0xbd   :  { %13 = sbr.rel (!%p11_p4) target bundleno = 1 (0x1), region = 73 }

</bundles_post_ra>
